<compile_context>
chip_gen: v6e
topology: v6e:2x2x1
jax: 0.10.0
libtpu: 0.0.40
codegen_flags: <defaults>
</compile_context>

<pallas_src>
import jax
import jax.numpy as jnp
from jax.experimental import pallas as pl
from jax.experimental.pallas import tpu as pltpu


# ----------------------------------------------------------------------------
# Primary path: zero-cost identity (no custom call, no HBM traffic).
# ----------------------------------------------------------------------------
def identity_layer(x: jax.Array) -> jax.Array:
    """IdentityLayer.forward: returns x unchanged.

    Returning x directly is strictly cheaper than any aliased Pallas call:
    without input donation XLA would have to materialize a defensive copy to
    satisfy input_output_aliases, silently reintroducing a full HBM copy.
    """
    return x


# ----------------------------------------------------------------------------
# Secondary path: fresh-buffer identity via one direct HBM->HBM DMA.
# ----------------------------------------------------------------------------
def _dma_copy_kernel(x_hbm_ref, o_hbm_ref, sem):
    # Single whole-array HBM->HBM DMA: no VMEM staging, no vld/vst traffic,
    # no grid, shape/dtype agnostic.
    cp = pltpu.make_async_copy(x_hbm_ref, o_hbm_ref, sem)
    cp.start()
    cp.wait()


def identity_copy(x: jax.Array) -> jax.Array:
    """Identity that materializes a new buffer (single HBM->HBM async DMA)."""
    if x.size == 0:
        # Degenerate case: nothing to DMA; hand back a fresh empty buffer.
        return jnp.empty(x.shape, x.dtype)

    nbytes = x.size * x.dtype.itemsize
    return pl.pallas_call(
        _dma_copy_kernel,
        out_shape=jax.ShapeDtypeStruct(x.shape, x.dtype),
        in_specs=[pl.BlockSpec(memory_space=pl.ANY)],
        out_specs=pl.BlockSpec(memory_space=pl.ANY),
        scratch_shapes=[pltpu.SemaphoreType.DMA],
        cost_estimate=pl.CostEstimate(
            flops=0,
            transcendentals=0,
            bytes_accessed=2 * nbytes,  # read + write; purely mem-bound
        ),
    )(x)


def is_zero_layer() -> bool:
    # Mirrors IdentityLayer.is_zero_layer()
    return False


if __name__ == "__main__":
    key = jax.random.PRNGKey(0)
    # NCHW input consistent with an encoder feature map.
    x = jax.random.normal(key, (2, 4, 16, 16), dtype=jnp.float32)

    # Primary path: zero-cost identity.
    y = jax.block_until_ready(identity_layer(x))
    assert y.shape == x.shape and y.dtype == x.dtype
    assert bool(jnp.all(y == x)), "identity output mismatch"

    # Fresh-buffer identity via direct HBM->HBM DMA (f32, aligned shape).
    y2 = jax.block_until_ready(identity_copy(x))
    assert y2.shape == x.shape and y2.dtype == x.dtype
    assert bool(jnp.all(y2 == x)), "DMA copy mismatch (f32)"

    # bf16 input — exercises sub-32-bit dtype with the same shape-agnostic DMA.
    x_bf16 = x.astype(jnp.bfloat16)
    y3 = jax.block_until_ready(identity_copy(x_bf16))
    assert y3.shape == x_bf16.shape and y3.dtype == x_bf16.dtype
    assert bool(jnp.all(y3 == x_bf16)), "DMA copy mismatch (bf16)"

    # Ragged / non-(8,128)-aligned shape — no pad, no slice, no fallback.
    x_ragged = jax.random.normal(jax.random.PRNGKey(1), (3, 5, 7), dtype=jnp.float32)
    y4 = jax.block_until_ready(identity_copy(x_ragged))
    assert y4.shape == x_ragged.shape and y4.dtype == x_ragged.dtype
    assert bool(jnp.all(y4 == x_ragged)), "DMA copy mismatch (ragged)"

    assert is_zero_layer() is False
    print("KERNEL_OK")
</pallas_src>

<mosaic_0001>
module attributes {stable_mosaic.version = 11 : i64} {
  func.func @_dma_copy_kernel(%arg0: memref<2x4x16x16xf32, #tpu.memory_space<any>>, %arg1: memref<2x4x16x16xf32, #tpu.memory_space<any>>, %arg2: memref<!tpu.dma_semaphore, #tpu.memory_space<semaphore_mem>>) attributes {dimension_semantics = [], scalar_prefetch = 0 : i64, scratch_operands = 1 : i64, tpu.core_type = #tpu.core_type<tc>} {
    tpu.enqueue_dma source(%arg0 : memref<2x4x16x16xf32, #tpu.memory_space<any>>) target(%arg1 : memref<2x4x16x16xf32, #tpu.memory_space<any>>) target_semaphore(%arg2 : memref<!tpu.dma_semaphore, #tpu.memory_space<semaphore_mem>>)
    tpu.wait_dma2 semaphore(%arg2 : memref<!tpu.dma_semaphore, #tpu.memory_space<semaphore_mem>>) src(%arg0 : memref<2x4x16x16xf32, #tpu.memory_space<any>>) dst(%arg1 : memref<2x4x16x16xf32, #tpu.memory_space<any>>)
    return
  }
}

</mosaic_0001>

<bundles_post_ra>
// kernel: tpu_custom_call.1
= control target key start
LH: loop header
LB: loop body
LE: loop exit
PB: predicated region body
PF: predicated region fallthrough
CT: control target
= control target key end

     0   :  { %s30_s6 = smov [#allocation2]   ;;  %s31_s7 = smov 131072   ;;  %s49_s0 = inlined_call_operand.hbm [shape: f32[2,4,16,16], index: 0, kind: input, shape index: {}]   ;;  %s50_s1 = inlined_call_operand.hbm [shape: f32[2,4,16,16], index: 1, kind: output, shape index: {}]  }
   0x1   :  { %s32_s8 = smov 0  }
   0x2   :  { %12 = dma.general %s49_s0, 2048, %s50_s1, %s30_s6, %s31_s7, [#allocation4], %s32_s8, 0  }
   0x3   :  { %28 = dma.done.wait [#allocation2], 2048 }
   0x4   :  { %29 = vsyncadd [#allocation2], 4294965248 }
   0x5   :  { %18 = vsyncmov [#allocation2] }
   0x8   :  { %s19_s13 = vpop.sfrf %18 }
   0x9   :  { %p24_p0 = scmp.ne.s32.totalorder %s19_s13, 0 }
   0xb   :  { %23 = shalt.err (%p24_p0)  }

</bundles_post_ra>
